<compile_context>
chip_gen: v5e
topology: v5e:2x2
jax: 0.10.0
libtpu: 0.0.40
codegen_flags: <defaults>
</compile_context>

<pallas_src>
import jax
import jax.numpy as jnp
from jax.experimental import pallas as pl
from jax.experimental.pallas import tpu as pltpu

B = 8        # batch
F_IN = 32    # input features
H = 64       # hidden features
C = 128      # output classes (lane-dense last dim)


def mlp_argmax_kernel(x_ref, w1_ref, b1_ref, w2_ref, b2_ref, out_ref):
    # hidden = relu(x @ W1 + b1)      (MXU, f32 accumulate)
    h = jnp.dot(x_ref[...], w1_ref[...], preferred_element_type=jnp.float32)
    h = jnp.maximum(h + b1_ref[...], 0.0)

    # logits = h @ W2 + b2
    logits = jnp.dot(h, w2_ref[...], preferred_element_type=jnp.float32)
    logits = logits + b2_ref[...]

    # argmax over last (lane) axis, first occurrence on ties == torch.argmax.
    m = jnp.max(logits, axis=-1, keepdims=True)
    col = jax.lax.broadcasted_iota(jnp.int32, logits.shape, 1)
    num_classes = logits.shape[-1]
    idx = jnp.min(jnp.where(logits == m, col, num_classes), axis=-1, keepdims=True)
    out_ref[...] = idx.astype(jnp.int32)


def net_with_result(x, w1, b1, w2, b2, *, tb=128):
    """logits = relu(x @ W1 + b1) @ W2 + b2 ; argmax over last axis (int32)."""
    b, f_in = x.shape
    h = w1.shape[1]
    c = w2.shape[1]

    if b <= tb:
        # Tiny batch: everything fits in a handful of vregs. No grid at all —
        # whole arrays are placed in VMEM, kernel runs once, zero pipeline
        # bookkeeping.
        out = pl.pallas_call(
            mlp_argmax_kernel,
            out_shape=jax.ShapeDtypeStruct((b, 1), jnp.int32),
            in_specs=[pl.BlockSpec(memory_space=pltpu.MemorySpace.VMEM)] * 5,
            out_specs=pl.BlockSpec(memory_space=pltpu.MemorySpace.VMEM),
        )(x, w1, b1, w2, b2)
    else:
        # Scaled batch: tile rows. Weights/biases use constant index_maps so
        # they stay VMEM-resident across grid steps; the batch axis is
        # "parallel" so v7x can shard it across its two TensorCores
        # (harmless on v5e/v6e).
        assert b % tb == 0, (b, tb)
        out = pl.pallas_call(
            mlp_argmax_kernel,
            out_shape=jax.ShapeDtypeStruct((b, 1), jnp.int32),
            grid=(b // tb,),
            in_specs=[
                pl.BlockSpec((tb, f_in), lambda i: (i, 0)),
                pl.BlockSpec((f_in, h), lambda i: (0, 0)),
                pl.BlockSpec((1, h), lambda i: (0, 0)),
                pl.BlockSpec((h, c), lambda i: (0, 0)),
                pl.BlockSpec((1, c), lambda i: (0, 0)),
            ],
            out_specs=pl.BlockSpec((tb, 1), lambda i: (i, 0)),
            compiler_params=pltpu.CompilerParams(
                dimension_semantics=("parallel",)),
        )(x, w1, b1, w2, b2)

    # torch.argmax returns a 1-D index tensor for a 2-D input.
    return out[:, 0]


def _reference(x, w1, b1, w2, b2):
    logits = jnp.maximum(x @ w1 + b1, 0.0) @ w2 + b2
    return jnp.argmax(logits, axis=-1).astype(jnp.int32)


if __name__ == "__main__":
    key = jax.random.PRNGKey(0)
    kx, k1, k2, k3, k4, kx2 = jax.random.split(key, 6)

    # deterministic synthetic parameters (shapes implied by the MLP "net")
    w1 = jax.random.normal(k1, (F_IN, H), dtype=jnp.float32) * 0.1
    b1 = jax.random.normal(k2, (1, H), dtype=jnp.float32) * 0.1
    w2 = jax.random.normal(k3, (H, C), dtype=jnp.float32) * 0.1
    b2 = jax.random.normal(k4, (1, C), dtype=jnp.float32) * 0.1

    # small batch -> gridless whole-VMEM path
    x_small = jax.random.normal(kx, (B, F_IN), dtype=jnp.float32)
    res_small = net_with_result(x_small, w1, b1, w2, b2)
    jax.block_until_ready(res_small)
    assert res_small.shape == (B,), res_small.shape
    assert bool(jnp.all(res_small == _reference(x_small, w1, b1, w2, b2)))

    # larger batch -> batch-tiled, weight-resident, "parallel" path
    B_BIG = 256
    x_big = jax.random.normal(kx2, (B_BIG, F_IN), dtype=jnp.float32)
    res_big = net_with_result(x_big, w1, b1, w2, b2, tb=128)
    jax.block_until_ready(res_big)
    assert res_big.shape == (B_BIG,), res_big.shape
    assert bool(jnp.all(res_big == _reference(x_big, w1, b1, w2, b2)))

    print("KERNEL_OK")
</pallas_src>

<mosaic_0001>
module attributes {stable_mosaic.version = 11 : i64} {
  func.func @mlp_argmax_kernel(%arg0: memref<8x32xf32, #tpu.memory_space<vmem>>, %arg1: memref<32x64xf32, #tpu.memory_space<vmem>>, %arg2: memref<1x64xf32, #tpu.memory_space<vmem>>, %arg3: memref<64x128xf32, #tpu.memory_space<vmem>>, %arg4: memref<1x128xf32, #tpu.memory_space<vmem>>, %arg5: memref<8x1xi32, #tpu.memory_space<vmem>>) attributes {dimension_semantics = [], scalar_prefetch = 0 : i64, scratch_operands = 0 : i64, tpu.core_type = #tpu.core_type<tc>} {
    %c0 = arith.constant 0 : index
    %c0_0 = arith.constant 0 : index
    %0 = vector.load %arg0[%c0, %c0_0] : memref<8x32xf32, #tpu.memory_space<vmem>>, vector<8x32xf32>
    %c0_1 = arith.constant 0 : index
    %c0_2 = arith.constant 0 : index
    %1 = vector.load %arg1[%c0_1, %c0_2] : memref<32x64xf32, #tpu.memory_space<vmem>>, vector<32x64xf32>
    %cst = arith.constant dense<0.000000e+00> : vector<8x64xf32>
    %2 = tpu.matmul %0, %1, %cst {dimension_numbers = #tpu.dot_dimension_numbers<[1], [0], [0], [1], [0, 0, 1, 1], [], []>} : vector<8x32xf32>, vector<32x64xf32>, vector<8x64xf32> -> vector<8x64xf32>
    %c0_3 = arith.constant 0 : index
    %c0_4 = arith.constant 0 : index
    %3 = vector.load %arg2[%c0_3, %c0_4] : memref<1x64xf32, #tpu.memory_space<vmem>>, vector<1x64xf32>
    %4 = vector.broadcast %3 : vector<1x64xf32> to vector<8x64xf32>
    %5 = arith.addf %2, %4 : vector<8x64xf32>
    %cst_5 = arith.constant 0.000000e+00 : f32
    %6 = vector.broadcast %cst_5 : f32 to vector<8x64xf32>
    %7 = arith.maximumf %5, %6 : vector<8x64xf32>
    %c0_6 = arith.constant 0 : index
    %c0_7 = arith.constant 0 : index
    %8 = vector.load %arg3[%c0_6, %c0_7] : memref<64x128xf32, #tpu.memory_space<vmem>>, vector<64x128xf32>
    %cst_8 = arith.constant dense<0.000000e+00> : vector<8x128xf32>
    %9 = tpu.matmul %7, %8, %cst_8 {dimension_numbers = #tpu.dot_dimension_numbers<[1], [0], [0], [1], [0, 0, 1, 1], [], []>} : vector<8x64xf32>, vector<64x128xf32>, vector<8x128xf32> -> vector<8x128xf32>
    %c0_9 = arith.constant 0 : index
    %c0_10 = arith.constant 0 : index
    %10 = vector.load %arg4[%c0_9, %c0_10] : memref<1x128xf32, #tpu.memory_space<vmem>>, vector<1x128xf32>
    %11 = vector.broadcast %10 : vector<1x128xf32> to vector<8x128xf32>
    %12 = arith.addf %9, %11 : vector<8x128xf32>
    %cst_11 = arith.constant dense<0xFF800000> : vector<8xf32>
    %13 = vector.multi_reduction <maximumf>, %12, %cst_11 [1] : vector<8x128xf32> to vector<8xf32>
    %14 = vector.shape_cast %13 : vector<8xf32> to vector<8x1xf32>
    %15 = tpu.iota {dimensions = array<i32: 1>} : vector<8x128xi32>
    %16 = vector.broadcast %14 : vector<8x1xf32> to vector<8x128xf32>
    %17 = arith.cmpf oeq, %12, %16 : vector<8x128xf32>
    %c128_i32 = arith.constant 128 : i32
    %18 = vector.broadcast %c128_i32 : i32 to vector<8x128xi32>
    %19 = arith.select %17, %15, %18 : vector<8x128xi1>, vector<8x128xi32>
    %cst_12 = arith.constant dense<2147483647> : vector<8xi32>
    %20 = vector.multi_reduction <minsi>, %19, %cst_12 [1] : vector<8x128xi32> to vector<8xi32>
    %21 = vector.shape_cast %20 : vector<8xi32> to vector<8x1xi32>
    %c0_13 = arith.constant 0 : index
    %c0_14 = arith.constant 0 : index
    %22 = vector.load %arg5[%c0_13, %c0_14] : memref<8x1xi32, #tpu.memory_space<vmem>>, vector<8x1xi32>
    tpu.vector_store %arg5[%c0_13, %c0_14], %21 {strides = array<i32>} : memref<8x1xi32, #tpu.memory_space<vmem>>, vector<8x1xi32>,
    return
  }
}

</mosaic_0001>

<bundles_post_ra>
// kernel: tpu_custom_call.1
= control target key start
LH: loop header
LB: loop body
LE: loop exit
PB: predicated region body
PF: predicated region fallthrough
CT: control target
= control target key end

     0   :  { %10 = vsyncpa [#allocation3], 0  ;;  %s301_s0 = inlined_call_operand.hbm [shape: f32[8,32], index: 0, kind: input, shape index: {}]   ;;  %s302_s1 = inlined_call_operand.hbm [shape: f32[32,64], index: 1, kind: input, shape index: {}]   ;;  %s303_s2 = inlined_call_operand.vmem [shape: f32[1,64], index: 2, kind: input, shape index: {}]   ;;  %s304_s3 = inlined_call_operand.hbm [shape: f32[64,128], index: 3, kind: input, shape index: {}]   ;;  %s305_s4 = inlined_call_operand.vmem [shape: f32[1,128], index: 4, kind: input, shape index: {}]   ;;  %s306_s5 = inlined_call_operand.vmem [shape: s32[8,1], index: 5, kind: output, shape index: {}]  }
   0x1   :  { %11 = vsyncpa [#allocation5], 0  ;;  %s27_s20 = sshll.u32 %s302_s1, 4  ;;  %s248_s21 = smov [#allocation4]   ;;  %s28_s20 = int_to_ptr.hbm [resolvable:$true] %s27_s20 }
   0x2   :  { %s29_s22 = sshll.u32 %s248_s21, 4  ;;  %s17_s25 = sshll.u32 %s301_s0, 4  ;;  %s30_s22 = int_to_ptr.vmem [resolvable:$true] %s29_s22  ;;  %s18_s25 = int_to_ptr.hbm [resolvable:$true] %s17_s25 }
   0x3   :  { %s249_s26 = smov 128   ;;  %s250_s27 = smov 8  }
   0x4   :  { %35 = dma.hbm_to_vmem [thread:$0]  %s28_s20, 512, %s30_s22, [#allocation5], %s249_s26, %s249_s26, %s250_s27  }
   0x5   :  { %s251_s28 = smov [#allocation2]   ;;  %s42_s7 = sshll.u32 %s304_s3, 4  ;;  %s43_s7 = int_to_ptr.hbm [resolvable:$true] %s42_s7 }
   0x6   :  { %s19_s29 = sshll.u32 %s251_s28, 4  ;;  %s252_s1 = smov [#allocation6]   ;;  %s20_s29 = int_to_ptr.vmem [resolvable:$true] %s19_s29 }
   0x7   :  { %22 = dma.hbm_to_vmem [thread:$0]  %s18_s25, 128, %s20_s29, [#allocation3]  }
   0x8   :  { %s44_s8 = sshll.u32 %s252_s1, 4  ;;  %s45_s8 = int_to_ptr.vmem [resolvable:$true] %s44_s8 }
   0x9   :  { %50 = dma.hbm_to_vmem [thread:$0]  %s43_s7, 1024, %s45_s8, [#allocation5], %s249_s26, %s249_s26, %s250_s27  }
   0xa   :  { %244 = dma.done.wait [#allocation3], 128  }
   0xb   :  { %245 = vsyncadd [#allocation3], 4294967168 }
   0xc   :  { %246 = dma.done.wait [#allocation5], 1536  }
   0xd   :  { %247 = vsyncadd [#allocation5], 4294965760  ;;  %v69_v0 = vld [vmem:[#allocation4 + $0x18] sm:$0xff]  ;;  %v68_v1 = vld [vmem:[#allocation4 + $0x10] sm:$0xff]  ;;  %vm74_vm0 = vcmask 261120   ;;  %vm111_vm1 = vcmask 523264   ;;  %v137_v20 = vlaneseq }
   0xe   :  { %90 = vmatpush.msra.mxu0 %v69_v0  ;;  %v106_v2 = vld [vmem:[#allocation6 + $0x38] sm:$0xff]  ;;  %v67_v3 = vld [vmem:[#allocation4 + $0x8] sm:$0xff]  ;;  %v105_v4 = vld [vmem:[#allocation6 + $0x30] sm:$0xff]  ;;  %vm155_vm4 = vcmask 7168  }
   0xf   :  { %123 = vmatpush.msra.mxu1 %v106_v2  ;;  %v104_v5 = vld [vmem:[#allocation6 + $0x28] sm:$0xff]  ;;  %v66_v6 = vld [vmem:[#allocation4] sm:$0xff]  ;;  %v65_v7 = vld [vmem:[#allocation2] sm:$0xff]  ;;  %v138_v21 = vand.u32 127, %v137_v20 }
  0x10   :  { %91 = vmatpush.msra.mxu0 %v68_v1  ;;  %v103_v8 = vld [vmem:[#allocation6 + $0x20] sm:$0xff]  ;;  %v102_v9 = vld [vmem:[#allocation6 + $0x18] sm:$0xff]  ;;  %v101_v10 = vld [vmem:[#allocation6 + $0x10] sm:$0xff] }
  0x11   :  { %124 = vmatpush.msra.mxu1 %v105_v4  ;;  %v100_v11 = vld [vmem:[#allocation6 + $0x8] sm:$0xff]  ;;  %v99_v12 = vld [vmem:[#allocation6] sm:$0xff]  ;;  %v170_v13 = vld [vmem:[%s303_s2] ss:$0 sm:$0xff] }
  0x12   :  { %92 = vmatpush.msra.mxu0 %v67_v3  ;;  %v171_v17 = vld [vmem:[%s305_s4] ss:$0 sm:$0xff] }
  0x13   :  { %125 = vmatpush.msra.mxu1 %v104_v5 }
  0x14   :  { %93 = vmatpush.msra.mxu0 %v66_v6 }
  0x15   :  { %163 = vmatmul.msk.f32.vlgmr.msra.gmra.mxu0 %vm74_vm0, %v65_v7  ;;  %126 = vmatpush.msra.mxu1 %v103_v8 }
  0x17   :  { %127 = vmatpush.msra.mxu1 %v102_v9 }
  0x19   :  { %128 = vmatpush.msra.mxu1 %v101_v10 }
  0x1b   :  { %129 = vmatpush.msra.mxu1 %v100_v11 }
  0x1d   :  { %130 = vmatpush.msra.mxu1 %v99_v12 }
  0x92   :  { %v95_v14 = vpop.f32.mrf.mxu0 }
  0x93   :  { %v96_v15 = vadd.f32 %v170_v13, %v95_v14 }
  0x95   :  { %v98_v16 = vmax.f32 %v96_v15, 0.0 }
  0x97   :  { %164 = vmatmul.msk.f32.vlgmr.msra.gmra.mxu1 %vm111_vm1, %v98_v16 }
 0x114   :  { %v132_v18 = vpop.f32.mrf.mxu1 }
 0x115   :  { %v133_v19 = vadd.f32 %v171_v17, %v132_v18 }
 0x117   :  { %135 = vmax.xlane.f32.xlu0 %v133_v19 }
 0x18a   :  { %v136_v22 = vpop.xlane.xlu0 %135 }
 0x18b   :  { %vm139_vm2 = vcmp.eq.f32.partialorder %v133_v19, %v136_v22 }
 0x18c   :  { %v140_v23 = vsel %vm139_vm2, %v138_v21, 128 }
 0x18d   :  { %v142_v24 = vshra.s32 %v140_v23, 16  ;;  %v141_v26 = vand.u32 65535, %v140_v23 }
 0x18f   :  { %v144_v25 = vcvt.s32.f32 %v142_v24  ;;  %v143_v28 = vcvt.s32.f32 %v141_v26 }
 0x191   :  { %145 = vmin.xlane.f32.xlu0 %v144_v25 }
 0x204   :  { %v146_v27 = vpop.xlane.xlu0 %145 }
 0x205   :  { %vm147_vm3 = vcmp.eq.f32.partialorder %v144_v25, %v146_v27  ;;  %v152_v30 = vcvt.f32.s32 %v146_v27 }
 0x206   :  { %v148_v29 = vsel %vm147_vm3, %v143_v28, inf }
 0x207   :  { %149 = vmin.xlane.f32.xlu1 %v148_v29  ;;  %v153_v32 = vshll.u32 %v152_v30, 16 }
 0x27a   :  { %v150_v31 = vpop.xlane.xlu1 %149 }
 0x27b   :  { %v151_v33 = vcvt.f32.s32 %v150_v31 }
 0x27d   :  { %v154_v34 = vadd.s32 %v153_v32, %v151_v33 }
 0x27f   :  { %156 = vst.msk [vmem:[%s306_s5] sm:$0xff] %vm155_vm4, %v154_v34 }
 0x280   :  { %161 = vsyncpa [#allocation3], 1 }
 0x281   :  { %162 = vsyncpa [#allocation5], 1 }

</bundles_post_ra>
